<compile_context>
chip_gen: v7x
topology: tpu7x:2x2x1
jax: 0.10.0
libtpu: 0.0.40
codegen_flags: <defaults>
</compile_context>

<pallas_src>
import functools

import jax
import jax.numpy as jnp
from jax.experimental import pallas as pl
from jax.experimental.pallas import tpu as pltpu


def _round_up(x, m):
    return ((x + m - 1) // m) * m


def _assortment_kernel(n_layers, x_ref, *refs):
    """MLP -> exp -> mask by input -> normalize over last dim.

    refs = (w_0..w_{L-1}, b_0..b_{L-1}, out_ref).  Hidden widths are padded
    to 128 lanes (zero-filled rows/cols), but the input and output feature
    dims stay at the true N, so loads/stores touch only real data and the
    reductions see only real lanes.
    """
    w_refs = refs[:n_layers]
    b_refs = refs[n_layers:2 * n_layers]
    out_ref = refs[2 * n_layers]

    h = x_ref[...]                                  # [TB, N] f32
    for i in range(n_layers):
        h = jnp.dot(h, w_refs[i][...],
                    preferred_element_type=jnp.float32) + b_refs[i][...]
        if i < n_layers - 1:
            h = jnp.maximum(h, 0.0)                 # ReLU on hidden layers

    # prob = exp(assorts) * IN ; prob /= prob.sum(-1, keepdims=True)
    # Subtract the row max (real lanes only) before exp: it cancels exactly
    # in the ratio and prevents overflow for large logits.
    m = jnp.max(h, axis=-1, keepdims=True)
    p = jnp.exp(h - m) * x_ref[...]                 # re-read x: short live range
    denom = jnp.sum(p, axis=-1, keepdims=True)
    # Guard all-zero rows (batch-padding rows or genuinely all-zero IN rows);
    # real rows with nonzero denom are numerically unchanged.  An all-zero IN
    # row yields 0s here instead of PyTorch's NaNs.
    denom = jnp.maximum(denom, jnp.finfo(jnp.float32).tiny)
    out_ref[...] = p * pl.reciprocal(denom, approx=False)


def prepare_params(weights, biases, *, lane=128):
    """One-time parameter padding (call at init, NOT per forward).

    Hidden widths are padded to a multiple of 128 lanes (zero-filled); the
    first layer's input dim and the last layer's output dim keep the true N,
    so x and the output need no HBM padding at call time.
    """
    n = len(weights)
    assert len(biases) == n
    w_p, b_p = [], []
    for i, (w, b) in enumerate(zip(weights, biases)):
        fi, fo = w.shape
        FI = fi if i == 0 else _round_up(fi, lane)
        FO = fo if i == n - 1 else _round_up(fo, lane)
        w_p.append(jnp.zeros((FI, FO), jnp.float32).at[:fi, :fo].set(
            jnp.asarray(w, jnp.float32)))
        b_p.append(jnp.zeros((1, FO), jnp.float32).at[:, :fo].set(
            jnp.asarray(b, jnp.float32).reshape(1, fo)))
    return w_p, b_p


def assortment_forward(x, padded_weights, padded_biases, *, tb_max=1024):
    """AssortmentNN forward with one pallas_call.

    x:               [B, N] float32 (the assortment indicator IN)
    padded_weights:  output of prepare_params (x @ W layout)
    padded_biases:   output of prepare_params ([1, FO] rows)
    """
    n_layers = len(padded_weights)
    assert len(padded_biases) == n_layers
    B, N = x.shape
    assert padded_weights[0].shape[0] == N
    assert padded_weights[-1].shape[1] == N

    x_in = x.astype(jnp.float32)
    B_pad = _round_up(B, 8)
    if B_pad != B:                      # only ragged batches pay for row padding
        x_in = jnp.zeros((B_pad, N), jnp.float32).at[:B].set(x_in)

    # >=2 grid steps whenever B_pad > 8 so ("parallel",) actually uses both
    # v7x TensorCores; cap the tile at tb_max rows for v5e/v6e overhead
    # amortization.  Partial final blocks are handled by Pallas.
    TB = min(tb_max, _round_up(pl.cdiv(B_pad, 2), 8))
    nb = pl.cdiv(B_pad, TB)

    kernel = functools.partial(_assortment_kernel, n_layers)
    out_shape = jax.ShapeDtypeStruct((B_pad, N), jnp.float32)
    out_spec = pl.BlockSpec((TB, N), lambda i: (i, 0))
    cparams = pltpu.CompilerParams(dimension_semantics=("parallel",))

    def const_spec(shape, single_buffered):
        # Constant index_map -> resident in VMEM across grid steps; single
        # buffering removes the useless second buffer when supported.
        if single_buffered:
            return pl.BlockSpec(shape, lambda i: (0, 0),
                                pipeline_mode=pl.Buffered(buffer_count=1))
        return pl.BlockSpec(shape, lambda i: (0, 0))

    last_err = None
    for single_buffered in (True, False):
        try:
            in_specs = [pl.BlockSpec((TB, N), lambda i: (i, 0))]
            in_specs += [const_spec(a.shape, single_buffered)
                         for a in (*padded_weights, *padded_biases)]
            out = pl.pallas_call(
                kernel,
                out_shape=out_shape,
                grid=(nb,),
                in_specs=in_specs,
                out_specs=out_spec,
                compiler_params=cparams,
            )(x_in, *padded_weights, *padded_biases)
            return out if B_pad == B else out[:B]
        except Exception as e:   # fall back if Buffered(1) is unsupported
            last_err = e
    raise last_err


def make_params(key, channels):
    """Deterministic PyTorch-nn.Linear-style init: U(-1/sqrt(fan_in), +...)."""
    weights, biases = [], []
    for i in range(len(channels) - 1):
        fan_in, fan_out = int(channels[i]), int(channels[i + 1])
        key, kw, kb = jax.random.split(key, 3)
        bound = 1.0 / (fan_in ** 0.5)
        w = jax.random.uniform(kw, (fan_in, fan_out), jnp.float32,
                               minval=-bound, maxval=bound)
        b = jax.random.uniform(kb, (1, fan_out), jnp.float32,
                               minval=-bound, maxval=bound)
        weights.append(w)
        biases.append(b)
    return weights, biases


def reference_forward(x, weights, biases):
    """Plain-JAX reference matching the PyTorch module's forward."""
    h = x
    n = len(weights)
    for i in range(n):
        h = h @ weights[i] + biases[i]
        if i < n - 1:
            h = jnp.maximum(h, 0.0)
    p = jnp.exp(h) * x
    return p / jnp.sum(p, axis=-1, keepdims=True)


if __name__ == "__main__":
    # Module config: Nprod_Veclen=32, Num_CrossEffectLayer=2,
    # Cross_midLayers=[64, 32]  ->  channels = [32, 64, 32]
    Nprod_Veclen = 32
    Cross_midLayers = [64, 32]
    assert Cross_midLayers[-1] == Nprod_Veclen
    channels = [Nprod_Veclen] + Cross_midLayers

    B = 8
    key = jax.random.PRNGKey(0)
    key, kx = jax.random.split(key)
    # IN acts as an assortment indicator / weighting vector; keep non-negative.
    x = jax.random.uniform(kx, (B, Nprod_Veclen), jnp.float32)

    weights, biases = make_params(key, channels)
    # One-time parameter padding, hoisted out of the per-call hot path.
    w_pad, b_pad = prepare_params(weights, biases)

    out = assortment_forward(x, w_pad, b_pad)
    out = jax.block_until_ready(out)

    ref = reference_forward(x, weights, biases)
    assert out.shape == (B, Nprod_Veclen)
    assert jnp.allclose(out, ref, atol=1e-5, rtol=1e-5)
    # Rows of the output are normalized probabilities.
    assert jnp.allclose(jnp.sum(out, axis=-1), 1.0, atol=1e-5)

    print("KERNEL_OK")
</pallas_src>

<mosaic_0001>
module attributes {stable_mosaic.version = 11 : i64} {
  func.func @_assortment_kernel(%arg0: i32, %arg1: memref<8x32xf32, #tpu.memory_space<vmem>>, %arg2: memref<32x128xf32, #tpu.memory_space<vmem>>, %arg3: memref<128x32xf32, #tpu.memory_space<vmem>>, %arg4: memref<1x128xf32, #tpu.memory_space<vmem>>, %arg5: memref<1x32xf32, #tpu.memory_space<vmem>>, %arg6: memref<8x32xf32, #tpu.memory_space<vmem>>) attributes {dimension_semantics = [#tpu.dimension_semantics<parallel>], iteration_bounds = array<i64: 1>, scalar_prefetch = 0 : i64, scratch_operands = 0 : i64, tpu.core_type = #tpu.core_type<tc>, window_params = [{transform_indices = @transform_0, window_bounds = array<i64: 8, 32>}, {pipeline_mode = #tpu.pipeline_mode<synchronous>, transform_indices = @transform_1, window_bounds = array<i64: 32, 128>}, {pipeline_mode = #tpu.pipeline_mode<synchronous>, transform_indices = @transform_2, window_bounds = array<i64: 128, 32>}, {pipeline_mode = #tpu.pipeline_mode<synchronous>, transform_indices = @transform_3, window_bounds = array<i64: 1, 128>}, {pipeline_mode = #tpu.pipeline_mode<synchronous>, transform_indices = @transform_4, window_bounds = array<i64: 1, 32>}, {transform_indices = @transform_5, window_bounds = array<i64: 8, 32>}]} {
    %c0 = arith.constant 0 : index
    %c0_0 = arith.constant 0 : index
    %0 = vector.load %arg1[%c0, %c0_0] : memref<8x32xf32, #tpu.memory_space<vmem>>, vector<8x32xf32>
    %c0_1 = arith.constant 0 : index
    %c0_2 = arith.constant 0 : index
    %1 = vector.load %arg2[%c0_1, %c0_2] : memref<32x128xf32, #tpu.memory_space<vmem>>, vector<32x128xf32>
    %cst = arith.constant dense<0.000000e+00> : vector<8x128xf32>
    %2 = tpu.matmul %0, %1, %cst {dimension_numbers = #tpu.dot_dimension_numbers<[1], [0], [0], [1], [0, 0, 1, 1], [], []>} : vector<8x32xf32>, vector<32x128xf32>, vector<8x128xf32> -> vector<8x128xf32>
    %c0_3 = arith.constant 0 : index
    %c0_4 = arith.constant 0 : index
    %3 = vector.load %arg4[%c0_3, %c0_4] : memref<1x128xf32, #tpu.memory_space<vmem>>, vector<1x128xf32>
    %4 = vector.broadcast %3 : vector<1x128xf32> to vector<8x128xf32>
    %5 = arith.addf %2, %4 : vector<8x128xf32>
    %cst_5 = arith.constant 0.000000e+00 : f32
    %6 = vector.broadcast %cst_5 : f32 to vector<8x128xf32>
    %7 = arith.maximumf %5, %6 : vector<8x128xf32>
    %c0_6 = arith.constant 0 : index
    %c0_7 = arith.constant 0 : index
    %8 = vector.load %arg3[%c0_6, %c0_7] : memref<128x32xf32, #tpu.memory_space<vmem>>, vector<128x32xf32>
    %cst_8 = arith.constant dense<0.000000e+00> : vector<8x32xf32>
    %9 = tpu.matmul %7, %8, %cst_8 {dimension_numbers = #tpu.dot_dimension_numbers<[1], [0], [0], [1], [0, 0, 1, 1], [], []>} : vector<8x128xf32>, vector<128x32xf32>, vector<8x32xf32> -> vector<8x32xf32>
    %c0_9 = arith.constant 0 : index
    %c0_10 = arith.constant 0 : index
    %10 = vector.load %arg5[%c0_9, %c0_10] : memref<1x32xf32, #tpu.memory_space<vmem>>, vector<1x32xf32>
    %11 = vector.broadcast %10 : vector<1x32xf32> to vector<8x32xf32>
    %12 = arith.addf %9, %11 : vector<8x32xf32>
    %cst_11 = arith.constant dense<0xFF800000> : vector<8xf32>
    %13 = vector.multi_reduction <maximumf>, %12, %cst_11 [1] : vector<8x32xf32> to vector<8xf32>
    %14 = vector.shape_cast %13 : vector<8xf32> to vector<8x1xf32>
    %15 = vector.broadcast %14 : vector<8x1xf32> to vector<8x32xf32>
    %16 = arith.subf %12, %15 : vector<8x32xf32>
    %17 = math.exp %16 : vector<8x32xf32>
    %c0_12 = arith.constant 0 : index
    %c0_13 = arith.constant 0 : index
    %18 = vector.load %arg1[%c0_12, %c0_13] : memref<8x32xf32, #tpu.memory_space<vmem>>, vector<8x32xf32>
    %19 = arith.mulf %17, %18 : vector<8x32xf32>
    %cst_14 = arith.constant dense<0.000000e+00> : vector<8xf32>
    %20 = vector.multi_reduction <add>, %19, %cst_14 [1] : vector<8x32xf32> to vector<8xf32>
    %21 = vector.shape_cast %20 : vector<8xf32> to vector<8x1xf32>
    %cst_15 = arith.constant 1.17549435E-38 : f32
    %22 = vector.broadcast %cst_15 : f32 to vector<8x1xf32>
    %23 = arith.maximumf %21, %22 : vector<8x1xf32>
    %24 = tpu.reciprocal %23 : vector<8x1xf32> -> vector<8x1xf32>
    %25 = vector.broadcast %24 : vector<8x1xf32> to vector<8x32xf32>
    %26 = arith.mulf %19, %25 : vector<8x32xf32>
    %c0_16 = arith.constant 0 : index
    %c0_17 = arith.constant 0 : index
    %27 = vector.load %arg6[%c0_16, %c0_17] : memref<8x32xf32, #tpu.memory_space<vmem>>, vector<8x32xf32>
    tpu.vector_store %arg6[%c0_16, %c0_17], %26 {strides = array<i32>} : memref<8x32xf32, #tpu.memory_space<vmem>>, vector<8x32xf32>,
    return
  }
  func.func @transform_0(%arg0: i32) -> (i32, i32) {
    %c0_i32 = arith.constant 0 : i32
    %c0_i32_0 = arith.constant 0 : i32
    return %arg0, %c0_i32 : i32, i32
  }
  func.func @transform_1(%arg0: i32) -> (i32, i32) {
    %c0_i32 = arith.constant 0 : i32
    %c0_i32_0 = arith.constant 0 : i32
    %c0_i32_1 = arith.constant 0 : i32
    return %c0_i32, %c0_i32_0 : i32, i32
  }
  func.func @transform_2(%arg0: i32) -> (i32, i32) {
    %c0_i32 = arith.constant 0 : i32
    %c0_i32_0 = arith.constant 0 : i32
    %c0_i32_1 = arith.constant 0 : i32
    return %c0_i32, %c0_i32_0 : i32, i32
  }
  func.func @transform_3(%arg0: i32) -> (i32, i32) {
    %c0_i32 = arith.constant 0 : i32
    %c0_i32_0 = arith.constant 0 : i32
    %c0_i32_1 = arith.constant 0 : i32
    return %c0_i32, %c0_i32_0 : i32, i32
  }
  func.func @transform_4(%arg0: i32) -> (i32, i32) {
    %c0_i32 = arith.constant 0 : i32
    %c0_i32_0 = arith.constant 0 : i32
    %c0_i32_1 = arith.constant 0 : i32
    return %c0_i32, %c0_i32_0 : i32, i32
  }
  func.func @transform_5(%arg0: i32) -> (i32, i32) {
    %c0_i32 = arith.constant 0 : i32
    %c0_i32_0 = arith.constant 0 : i32
    return %arg0, %c0_i32 : i32, i32
  }
}

module attributes {stable_mosaic.version = 11 : i64} {
  func.func @_assortment_kernel(%arg0: i32, %arg1: memref<8x32xf32, #tpu.memory_space<vmem>>, %arg2: memref<32x128xf32, #tpu.memory_space<vmem>>, %arg3: memref<128x32xf32, #tpu.memory_space<vmem>>, %arg4: memref<1x128xf32, #tpu.memory_space<vmem>>, %arg5: memref<1x32xf32, #tpu.memory_space<vmem>>, %arg6: memref<8x32xf32, #tpu.memory_space<vmem>>) attributes {dimension_semantics = [#tpu.dimension_semantics<parallel>], iteration_bounds = array<i64: 1>, scalar_prefetch = 0 : i64, scratch_operands = 0 : i64, tpu.core_type = #tpu.core_type<tc>, window_params = [{transform_indices = @transform_0, window_bounds = array<i64: 8, 32>}, {pipeline_mode = #tpu.pipeline_mode<synchronous>, transform_indices = @transform_1, window_bounds = array<i64: 32, 128>}, {pipeline_mode = #tpu.pipeline_mode<synchronous>, transform_indices = @transform_2, window_bounds = array<i64: 128, 32>}, {pipeline_mode = #tpu.pipeline_mode<synchronous>, transform_indices = @transform_3, window_bounds = array<i64: 1, 128>}, {pipeline_mode = #tpu.pipeline_mode<synchronous>, transform_indices = @transform_4, window_bounds = array<i64: 1, 32>}, {transform_indices = @transform_5, window_bounds = array<i64: 8, 32>}]} {
    %c0 = arith.constant 0 : index
    %c0_0 = arith.constant 0 : index
    %0 = vector.load %arg1[%c0, %c0_0] : memref<8x32xf32, #tpu.memory_space<vmem>>, vector<8x32xf32>
    %c0_1 = arith.constant 0 : index
    %c0_2 = arith.constant 0 : index
    %1 = vector.load %arg2[%c0_1, %c0_2] : memref<32x128xf32, #tpu.memory_space<vmem>>, vector<32x128xf32>
    %cst = arith.constant dense<0.000000e+00> : vector<8x128xf32>
    %2 = tpu.matmul %0, %1, %cst {dimension_numbers = #tpu.dot_dimension_numbers<[1], [0], [0], [1], [0, 0, 1, 1], [], []>} : vector<8x32xf32>, vector<32x128xf32>, vector<8x128xf32> -> vector<8x128xf32>
    %c0_3 = arith.constant 0 : index
    %c0_4 = arith.constant 0 : index
    %3 = vector.load %arg4[%c0_3, %c0_4] : memref<1x128xf32, #tpu.memory_space<vmem>>, vector<1x128xf32>
    %4 = vector.broadcast %3 : vector<1x128xf32> to vector<8x128xf32>
    %5 = arith.addf %2, %4 : vector<8x128xf32>
    %cst_5 = arith.constant 0.000000e+00 : f32
    %6 = vector.broadcast %cst_5 : f32 to vector<8x128xf32>
    %7 = arith.maximumf %5, %6 : vector<8x128xf32>
    %c0_6 = arith.constant 0 : index
    %c0_7 = arith.constant 0 : index
    %8 = vector.load %arg3[%c0_6, %c0_7] : memref<128x32xf32, #tpu.memory_space<vmem>>, vector<128x32xf32>
    %cst_8 = arith.constant dense<0.000000e+00> : vector<8x32xf32>
    %9 = tpu.matmul %7, %8, %cst_8 {dimension_numbers = #tpu.dot_dimension_numbers<[1], [0], [0], [1], [0, 0, 1, 1], [], []>} : vector<8x128xf32>, vector<128x32xf32>, vector<8x32xf32> -> vector<8x32xf32>
    %c0_9 = arith.constant 0 : index
    %c0_10 = arith.constant 0 : index
    %10 = vector.load %arg5[%c0_9, %c0_10] : memref<1x32xf32, #tpu.memory_space<vmem>>, vector<1x32xf32>
    %11 = vector.broadcast %10 : vector<1x32xf32> to vector<8x32xf32>
    %12 = arith.addf %9, %11 : vector<8x32xf32>
    %cst_11 = arith.constant dense<0xFF800000> : vector<8xf32>
    %13 = vector.multi_reduction <maximumf>, %12, %cst_11 [1] : vector<8x32xf32> to vector<8xf32>
    %14 = vector.shape_cast %13 : vector<8xf32> to vector<8x1xf32>
    %15 = vector.broadcast %14 : vector<8x1xf32> to vector<8x32xf32>
    %16 = arith.subf %12, %15 : vector<8x32xf32>
    %17 = math.exp %16 : vector<8x32xf32>
    %c0_12 = arith.constant 0 : index
    %c0_13 = arith.constant 0 : index
    %18 = vector.load %arg1[%c0_12, %c0_13] : memref<8x32xf32, #tpu.memory_space<vmem>>, vector<8x32xf32>
    %19 = arith.mulf %17, %18 : vector<8x32xf32>
    %cst_14 = arith.constant dense<0.000000e+00> : vector<8xf32>
    %20 = vector.multi_reduction <add>, %19, %cst_14 [1] : vector<8x32xf32> to vector<8xf32>
    %21 = vector.shape_cast %20 : vector<8xf32> to vector<8x1xf32>
    %cst_15 = arith.constant 1.17549435E-38 : f32
    %22 = vector.broadcast %cst_15 : f32 to vector<8x1xf32>
    %23 = arith.maximumf %21, %22 : vector<8x1xf32>
    %24 = tpu.reciprocal %23 : vector<8x1xf32> -> vector<8x1xf32>
    %25 = vector.broadcast %24 : vector<8x1xf32> to vector<8x32xf32>
    %26 = arith.mulf %19, %25 : vector<8x32xf32>
    %c0_16 = arith.constant 0 : index
    %c0_17 = arith.constant 0 : index
    %27 = vector.load %arg6[%c0_16, %c0_17] : memref<8x32xf32, #tpu.memory_space<vmem>>, vector<8x32xf32>
    tpu.vector_store %arg6[%c0_16, %c0_17], %26 {strides = array<i32>} : memref<8x32xf32, #tpu.memory_space<vmem>>, vector<8x32xf32>,
    return
  }
  func.func @transform_0(%arg0: i32) -> (i32, i32) {
    %c0_i32 = arith.constant 0 : i32
    %c0_i32_0 = arith.constant 0 : i32
    return %arg0, %c0_i32 : i32, i32
  }
  func.func @transform_1(%arg0: i32) -> (i32, i32) {
    %c0_i32 = arith.constant 0 : i32
    %c0_i32_0 = arith.constant 0 : i32
    %c0_i32_1 = arith.constant 0 : i32
    return %c0_i32, %c0_i32_0 : i32, i32
  }
  func.func @transform_2(%arg0: i32) -> (i32, i32) {
    %c0_i32 = arith.constant 0 : i32
    %c0_i32_0 = arith.constant 0 : i32
    %c0_i32_1 = arith.constant 0 : i32
    return %c0_i32, %c0_i32_0 : i32, i32
  }
  func.func @transform_3(%arg0: i32) -> (i32, i32) {
    %c0_i32 = arith.constant 0 : i32
    %c0_i32_0 = arith.constant 0 : i32
    %c0_i32_1 = arith.constant 0 : i32
    return %c0_i32, %c0_i32_0 : i32, i32
  }
  func.func @transform_4(%arg0: i32) -> (i32, i32) {
    %c0_i32 = arith.constant 0 : i32
    %c0_i32_0 = arith.constant 0 : i32
    %c0_i32_1 = arith.constant 0 : i32
    return %c0_i32, %c0_i32_0 : i32, i32
  }
  func.func @transform_5(%arg0: i32) -> (i32, i32) {
    %c0_i32 = arith.constant 0 : i32
    %c0_i32_0 = arith.constant 0 : i32
    return %arg0, %c0_i32 : i32, i32
  }
}

</mosaic_0001>

<bundles_post_ra>
// kernel: tpu_custom_call.1
= control target key start
LH: loop header
LB: loop body
LE: loop exit
PB: predicated region body
PF: predicated region fallthrough
CT: control target
= control target key end

     0   :  { %v362_v3 = vmov 0.0|0.0   ;;  %vm363_vm0 = vmmov 0   ;;  %v364_v6 = vmov 0.0   ;;  %s481_s0 = inlined_call_operand.vmem [shape: f32[8,32], index: 0, kind: input, shape index: {}]   ;;  %s482_s1 = inlined_call_operand.vmem [shape: f32[32,128], index: 1, kind: input, shape index: {}]   ;;  %s483_s2 = inlined_call_operand.vmem [shape: f32[128,32], index: 2, kind: input, shape index: {}]   ;;  %s484_s3 = inlined_call_operand.vmem [shape: f32[1,128], index: 3, kind: input, shape index: {}]   ;;  %s485_s4 = inlined_call_operand.vmem [shape: f32[1,32], index: 4, kind: input, shape index: {}]   ;;  %s486_s5 = inlined_call_operand.hbm [shape: f32[8,32], index: 5, kind: output, shape index: {}]  }
   0x1   :  { %v22_v0 = vld [vmem:[%s482_s1] sm:$0xff]  ;;  %v23_v1 = vld [vmem:[%s482_s1 + $0x8] sm:$0xff]  ;;  %v24_v2 = vld [vmem:[%s482_s1 + $0x10] sm:$0xff]  ;;  %300 = vmatprep.subr.bf16.mxu0 %v362_v3  ;;  %262 = vmatprep.mubr.msk.f32.mxu0 %vm363_vm0, %v364_v6 }
   0x2   :  { %v301_v4 = vpack.c.bf16 %v23_v1, %v22_v0  ;;  %v25_v5 = vld [vmem:[%s482_s1 + $0x18] sm:$0xff]  ;;  %v108_v7 = vld [vmem:[%s483_s2] sm:$0xff]  ;;  %306 = vmatprep.subr.bf16.mxu1 %v362_v3  ;;  %v109_v8 = vld [vmem:[%s483_s2 + $0x8] sm:$0xff]  ;;  %297 = vmatprep.mubr.msk.f32.mxu1 %vm363_vm0, %v364_v6 }
   0x3   :  { %v110_v9 = vld [vmem:[%s483_s2 + $0x10] sm:$0xff]  ;;  %v111_v10 = vld [vmem:[%s483_s2 + $0x18] sm:$0xff]  ;;  %v304_v11 = vpack.c.bf16 %v25_v5, %v24_v2  ;;  %v307_v12 = vpack.c.bf16 %v109_v8, %v108_v7  ;;  %v112_v14 = vld [vmem:[%s483_s2 + $0x20] sm:$0xff] }
   0x4   :  { %302 = vmatpush3.bf16.msra.mxu0 %v301_v4  ;;  %v310_v13 = vpack.c.bf16 %v111_v10, %v110_v9  ;;  %v113_v15 = vld [vmem:[%s483_s2 + $0x28] sm:$0xff] }
   0x5   :  { %303 = vmatprep.subr.bf16.mxu0 %v362_v3  ;;  %308 = vmatpush3.bf16.msra.mxu1 %v307_v12 }
   0x6   :  { %309 = vmatprep.subr.bf16.mxu1 %v362_v3 }
   0x7   :  { %10 = vsyncpa [#allocation3], 0  ;;  %v21_v16 = vld [vmem:[%s481_s0] sm:$0xff]  ;;  %vm33_vm1 = vcmask 261120   ;;  %v313_v17 = vpack.c.bf16 %v113_v15, %v112_v14  ;;  %v114_v18 = vld [vmem:[%s483_s2 + $0x30] sm:$0xff] }
   0x8   :  { %305 = vmatpush3.bf16.msra.mxu0 %v304_v11  ;;  %v115_v19 = vld [vmem:[%s483_s2 + $0x38] sm:$0xff]  ;;  %v116_v21 = vld [vmem:[%s483_s2 + $0x40] sm:$0xff]  ;;  %v117_v22 = vld [vmem:[%s483_s2 + $0x48] sm:$0xff] }
   0x9   :  { %311 = vmatpush3.bf16.msra.mxu1 %v310_v13  ;;  %v316_v20 = vpack.c.bf16 %v115_v19, %v114_v18  ;;  %v319_v23 = vpack.c.bf16 %v117_v22, %v116_v21  ;;  %v118_v24 = vld [vmem:[%s483_s2 + $0x50] sm:$0xff]  ;;  %v119_v25 = vld [vmem:[%s483_s2 + $0x58] sm:$0xff]  ;;  %v120_v27 = vld [vmem:[%s483_s2 + $0x60] sm:$0xff] }
   0xa   :  { %312 = vmatprep.subr.bf16.mxu1 %v362_v3  ;;  %v322_v26 = vpack.c.bf16 %v119_v25, %v118_v24  ;;  %v121_v28 = vld [vmem:[%s483_s2 + $0x68] sm:$0xff]  ;;  %v122_v30 = vld [vmem:[%s483_s2 + $0x70] sm:$0xff]  ;;  %v123_v31 = vld [vmem:[%s483_s2 + $0x78] sm:$0xff]  ;;  %s365_s2 = smov [#allocation2]  }
   0xb   :  { %263 = vmatmul.mubr.msk.f32.vlgmr.msra.gmra.mrb[0].mxu0 %vm33_vm1, %v21_v16  ;;  %v325_v29 = vpack.c.bf16 %v121_v28, %v120_v27  ;;  %v328_v32 = vpack.c.bf16 %v123_v31, %v122_v30  ;;  %v229_v33 = vld [vmem:[%s484_s3] ss:$0 sm:$0xff]  ;;  %s221_s3 = sshll.u32 %s365_s2, 4  ;;  %s222_s3 = int_to_ptr.vmem [resolvable:$true] %s221_s3 }
   0xc   :  { %v231_v38 = vld [vmem:[%s485_s4] ss:$0 sm:$0xff]  ;;  %s338_s4 = scalar_lea.vmem %s222_s3, 128  ;;  %p343_p1 = scmp.lt.s32.totalorder %s222_s3, %s222_s3 }
   0xd   :  { %314 = vmatpush3.bf16.msra.mxu1 %v313_v17  ;;  %p339_p0 = scmp.ne.s32.totalorder %s222_s3, %s338_s4  ;;  %p344_p2 = scmp.lt.s32.totalorder %s338_s4, %s338_s4 }
   0xe   :  { %315 = vmatprep.subr.bf16.mxu1 %v362_v3 }
   0xf   :  { %p345_p3 = por %p344_p2, %p343_p1 }
  0x11   :  { %317 = vmatpush3.bf16.msra.mxu1 %v316_v20  ;;  %p346_p4 = pnand %p345_p3, %p339_p0 }
  0x12   :  { %318 = vmatprep.subr.bf16.mxu1 %v362_v3 }
  0x15   :  { %320 = vmatpush3.bf16.msra.mxu1 %v319_v23 }
  0x16   :  { %321 = vmatprep.subr.bf16.mxu1 %v362_v3 }
  0x19   :  { %323 = vmatpush3.bf16.msra.mxu1 %v322_v26 }
  0x1a   :  { %324 = vmatprep.subr.bf16.mxu1 %v362_v3 }
  0x1d   :  { %326 = vmatpush3.bf16.msra.mxu1 %v325_v29 }
  0x1e   :  { %327 = vmatprep.subr.bf16.mxu1 %v362_v3 }
  0x21   :  { %329 = vmatpush3.bf16.msra.mxu1 %v328_v32 }
  0xde   :  { %v103_v34 = vpop.f32.mrb[0].mxu0 }
  0xdf   :  { %v104_v35 = vadd.f32 %v229_v33, %v103_v34  ;;  %v264_v36 = vpop.f32.mrb[1].mxu0 }
  0xe1   :  { %v107_v37 = vmax.f32 %v104_v35, 0.0 }
  0xe3   :  { %298 = vmatmul.mubr.f32.vlgmr.msra.gmra.mrb[0].mxu1 %v107_v37 }
 0x1b6   :  { %v197_v39 = vpop.f32.mrb[0].mxu1 }
 0x1b7   :  { %v198_v40 = vadd.f32 %v231_v38, %v197_v39  ;;  %v299_v41 = vpop.f32.mrb[1].mxu1 }
 0x1b9   :  { %v201_v42 = vsel %vm33_vm1, %v198_v40, -inf }
 0x1ba   :  { %202 = vmax.xlane.f32.xlu0 %v201_v42 }
 0x247   :  { %v203_v43 = vpop.xlane.xlu0 %202 }
 0x248   :  { %v204_v44 = vsub.f32 %v198_v40, %v203_v43 }
 0x24a   :  { %v205_v45 = vmul.f32 1.442695, %v204_v44 }
 0x24c   :  { %334 = vpow2.f32 %v205_v45 }
 0x256   :  { %v335_v46 = vpop.eup %334 }
 0x257   :  { %v207_v47 = vmul.f32 %v335_v46, %v21_v16 }
 0x259   :  { %v208_v48 = vsel %vm33_vm1, %v207_v47, 0.0 }
 0x25a   :  { %209 = vadd.xlane.f32.xlu0 %v208_v48 }
 0x2e7   :  { %v210_v49 = vpop.xlane.xlu0 %209 }
 0x2e8   :  { %v211_v50 = vmax.f32 %v210_v49, 1.1754944e-38 }
 0x2ea   :  { %336 = vrcp.f32 %v211_v50 }
 0x2f4   :  { %v337_v51 = vpop.eup %336 }
 0x2f5   :  { %v213_v52 = vmul.f32 %v337_v51, %v207_v47 }
 0x2f7   :  { %214 = vst.msk [vmem:[#allocation2] sm:$0xff] %vm33_vm1, %v213_v52 }
 0x2f8   :  { %349 = shalt.err (!%p346_p4)
}
 0x2f9   :  { %s350_s13 = scalar_lea.hbm %s486_s5, 128 }
 0x2fa   :  { %p351_p5 = scmp.ne.s32.totalorder %s486_s5, %s350_s13  ;;  %p354_p6 = scmp.lt.u32.totalorder %s350_s13, %s486_s5 }
 0x2fc   :  { %p356_p7 = pnand %p354_p6, %p351_p5 }
 0x2fe   :  { %359 = shalt.err (!%p356_p7)
}
 0x2ff   :  { %224 = dma.vmem_to_hbm [thread:$0]  %s222_s3, 128, %s486_s5, [#allocation3]  }
 0x300   :  { %360 = dma.done.wait [#allocation3], 128  }
 0x301   :  { %361 = vsyncadd [#allocation3], 4294967168 }
 0x302   :  { %228 = vsyncpa [#allocation3], 1 }

// kernel: tpu_custom_call.1
= control target key start
LH: loop header
LB: loop body
LE: loop exit
PB: predicated region body
PF: predicated region fallthrough
CT: control target
= control target key end

     0   :  { %v362_v3 = vmov 0.0|0.0   ;;  %vm363_vm0 = vmmov 0   ;;  %v364_v6 = vmov 0.0   ;;  %s481_s0 = inlined_call_operand.vmem [shape: f32[8,32], index: 0, kind: input, shape index: {}]   ;;  %s482_s1 = inlined_call_operand.vmem [shape: f32[32,128], index: 1, kind: input, shape index: {}]   ;;  %s483_s2 = inlined_call_operand.vmem [shape: f32[128,32], index: 2, kind: input, shape index: {}]   ;;  %s484_s3 = inlined_call_operand.vmem [shape: f32[1,128], index: 3, kind: input, shape index: {}]   ;;  %s485_s4 = inlined_call_operand.vmem [shape: f32[1,32], index: 4, kind: input, shape index: {}]   ;;  %s486_s5 = inlined_call_operand.hbm [shape: f32[8,32], index: 5, kind: output, shape index: {}]  }
   0x1   :  { %v22_v0 = vld [vmem:[%s482_s1] sm:$0xff]  ;;  %v23_v1 = vld [vmem:[%s482_s1 + $0x8] sm:$0xff]  ;;  %v24_v2 = vld [vmem:[%s482_s1 + $0x10] sm:$0xff]  ;;  %300 = vmatprep.subr.bf16.mxu0 %v362_v3  ;;  %262 = vmatprep.mubr.msk.f32.mxu0 %vm363_vm0, %v364_v6 }
   0x2   :  { %v301_v4 = vpack.c.bf16 %v23_v1, %v22_v0  ;;  %v25_v5 = vld [vmem:[%s482_s1 + $0x18] sm:$0xff]  ;;  %v108_v7 = vld [vmem:[%s483_s2] sm:$0xff]  ;;  %306 = vmatprep.subr.bf16.mxu1 %v362_v3  ;;  %v109_v8 = vld [vmem:[%s483_s2 + $0x8] sm:$0xff]  ;;  %297 = vmatprep.mubr.msk.f32.mxu1 %vm363_vm0, %v364_v6 }
   0x3   :  { %v110_v9 = vld [vmem:[%s483_s2 + $0x10] sm:$0xff]  ;;  %v111_v10 = vld [vmem:[%s483_s2 + $0x18] sm:$0xff]  ;;  %v304_v11 = vpack.c.bf16 %v25_v5, %v24_v2  ;;  %v307_v12 = vpack.c.bf16 %v109_v8, %v108_v7  ;;  %v112_v14 = vld [vmem:[%s483_s2 + $0x20] sm:$0xff] }
   0x4   :  { %302 = vmatpush3.bf16.msra.mxu0 %v301_v4  ;;  %v310_v13 = vpack.c.bf16 %v111_v10, %v110_v9  ;;  %v113_v15 = vld [vmem:[%s483_s2 + $0x28] sm:$0xff] }
   0x5   :  { %303 = vmatprep.subr.bf16.mxu0 %v362_v3  ;;  %308 = vmatpush3.bf16.msra.mxu1 %v307_v12 }
   0x6   :  { %309 = vmatprep.subr.bf16.mxu1 %v362_v3 }
   0x7   :  { %10 = vsyncpa [#allocation3], 0  ;;  %v21_v16 = vld [vmem:[%s481_s0] sm:$0xff]  ;;  %vm33_vm1 = vcmask 261120   ;;  %v313_v17 = vpack.c.bf16 %v113_v15, %v112_v14  ;;  %v114_v18 = vld [vmem:[%s483_s2 + $0x30] sm:$0xff] }
   0x8   :  { %305 = vmatpush3.bf16.msra.mxu0 %v304_v11  ;;  %v115_v19 = vld [vmem:[%s483_s2 + $0x38] sm:$0xff]  ;;  %v116_v21 = vld [vmem:[%s483_s2 + $0x40] sm:$0xff]  ;;  %v117_v22 = vld [vmem:[%s483_s2 + $0x48] sm:$0xff] }
   0x9   :  { %311 = vmatpush3.bf16.msra.mxu1 %v310_v13  ;;  %v316_v20 = vpack.c.bf16 %v115_v19, %v114_v18  ;;  %v319_v23 = vpack.c.bf16 %v117_v22, %v116_v21  ;;  %v118_v24 = vld [vmem:[%s483_s2 + $0x50] sm:$0xff]  ;;  %v119_v25 = vld [vmem:[%s483_s2 + $0x58] sm:$0xff]  ;;  %v120_v27 = vld [vmem:[%s483_s2 + $0x60] sm:$0xff] }
   0xa   :  { %312 = vmatprep.subr.bf16.mxu1 %v362_v3  ;;  %v322_v26 = vpack.c.bf16 %v119_v25, %v118_v24  ;;  %v121_v28 = vld [vmem:[%s483_s2 + $0x68] sm:$0xff]  ;;  %v122_v30 = vld [vmem:[%s483_s2 + $0x70] sm:$0xff]  ;;  %v123_v31 = vld [vmem:[%s483_s2 + $0x78] sm:$0xff]  ;;  %s365_s2 = smov [#allocation2]  }
   0xb   :  { %263 = vmatmul.mubr.msk.f32.vlgmr.msra.gmra.mrb[0].mxu0 %vm33_vm1, %v21_v16  ;;  %v325_v29 = vpack.c.bf16 %v121_v28, %v120_v27  ;;  %v328_v32 = vpack.c.bf16 %v123_v31, %v122_v30  ;;  %v229_v33 = vld [vmem:[%s484_s3] ss:$0 sm:$0xff]  ;;  %s221_s3 = sshll.u32 %s365_s2, 4  ;;  %s222_s3 = int_to_ptr.vmem [resolvable:$true] %s221_s3 }
   0xc   :  { %v231_v38 = vld [vmem:[%s485_s4] ss:$0 sm:$0xff]  ;;  %s338_s4 = scalar_lea.vmem %s222_s3, 128  ;;  %p343_p1 = scmp.lt.s32.totalorder %s222_s3, %s222_s3 }
   0xd   :  { %314 = vmatpush3.bf16.msra.mxu1 %v313_v17  ;;  %p339_p0 = scmp.ne.s32.totalorder %s222_s3, %s338_s4  ;;  %p344_p2 = scmp.lt.s32.totalorder %s338_s4, %s338_s4 }
   0xe   :  { %315 = vmatprep.subr.bf16.mxu1 %v362_v3 }
   0xf   :  { %p345_p3 = por %p344_p2, %p343_p1 }
  0x11   :  { %317 = vmatpush3.bf16.msra.mxu1 %v316_v20  ;;  %p346_p4 = pnand %p345_p3, %p339_p0 }
  0x12   :  { %318 = vmatprep.subr.bf16.mxu1 %v362_v3 }
  0x15   :  { %320 = vmatpush3.bf16.msra.mxu1 %v319_v23 }
  0x16   :  { %321 = vmatprep.subr.bf16.mxu1 %v362_v3 }
  0x19   :  { %323 = vmatpush3.bf16.msra.mxu1 %v322_v26 }
  0x1a   :  { %324 = vmatprep.subr.bf16.mxu1 %v362_v3 }
  0x1d   :  { %326 = vmatpush3.bf16.msra.mxu1 %v325_v29 }
  0x1e   :  { %327 = vmatprep.subr.bf16.mxu1 %v362_v3 }
  0x21   :  { %329 = vmatpush3.bf16.msra.mxu1 %v328_v32 }
  0xde   :  { %v103_v34 = vpop.f32.mrb[0].mxu0 }
  0xdf   :  { %v104_v35 = vadd.f32 %v229_v33, %v103_v34  ;;  %v264_v36 = vpop.f32.mrb[1].mxu0 }
  0xe1   :  { %v107_v37 = vmax.f32 %v104_v35, 0.0 }
  0xe3   :  { %298 = vmatmul.mubr.f32.vlgmr.msra.gmra.mrb[0].mxu1 %v107_v37 }
 0x1b6   :  { %v197_v39 = vpop.f32.mrb[0].mxu1 }
 0x1b7   :  { %v198_v40 = vadd.f32 %v231_v38, %v197_v39  ;;  %v299_v41 = vpop.f32.mrb[1].mxu1 }
 0x1b9   :  { %v201_v42 = vsel %vm33_vm1, %v198_v40, -inf }
 0x1ba   :  { %202 = vmax.xlane.f32.xlu0 %v201_v42 }
 0x247   :  { %v203_v43 = vpop.xlane.xlu0 %202 }
 0x248   :  { %v204_v44 = vsub.f32 %v198_v40, %v203_v43 }
 0x24a   :  { %v205_v45 = vmul.f32 1.442695, %v204_v44 }
 0x24c   :  { %334 = vpow2.f32 %v205_v45 }
 0x256   :  { %v335_v46 = vpop.eup %334 }
 0x257   :  { %v207_v47 = vmul.f32 %v335_v46, %v21_v16 }
 0x259   :  { %v208_v48 = vsel %vm33_vm1, %v207_v47, 0.0 }
 0x25a   :  { %209 = vadd.xlane.f32.xlu0 %v208_v48 }
 0x2e7   :  { %v210_v49 = vpop.xlane.xlu0 %209 }
 0x2e8   :  { %v211_v50 = vmax.f32 %v210_v49, 1.1754944e-38 }
 0x2ea   :  { %336 = vrcp.f32 %v211_v50 }
 0x2f4   :  { %v337_v51 = vpop.eup %336 }
 0x2f5   :  { %v213_v52 = vmul.f32 %v337_v51, %v207_v47 }
 0x2f7   :  { %214 = vst.msk [vmem:[#allocation2] sm:$0xff] %vm33_vm1, %v213_v52 }
 0x2f8   :  { %349 = shalt.err (!%p346_p4)
}
 0x2f9   :  { %s350_s13 = scalar_lea.hbm %s486_s5, 128 }
 0x2fa   :  { %p351_p5 = scmp.ne.s32.totalorder %s486_s5, %s350_s13  ;;  %p354_p6 = scmp.lt.u32.totalorder %s350_s13, %s486_s5 }
 0x2fc   :  { %p356_p7 = pnand %p354_p6, %p351_p5 }
 0x2fe   :  { %359 = shalt.err (!%p356_p7)
}
 0x2ff   :  { %224 = dma.vmem_to_hbm [thread:$0]  %s222_s3, 128, %s486_s5, [#allocation3]  }
 0x300   :  { %360 = dma.done.wait [#allocation3], 128  }
 0x301   :  { %361 = vsyncadd [#allocation3], 4294967168 }
 0x302   :  { %228 = vsyncpa [#allocation3], 1 }

</bundles_post_ra>
